<compile_context>
chip_gen: v7x
topology: tpu7x:2x2x1
jax: 0.10.0
libtpu: 0.0.40
codegen_flags: <defaults>
</compile_context>

<pallas_src>
import jax
import jax.numpy as jnp
from jax.experimental import pallas as pl
from jax.experimental.pallas import tpu as pltpu


def _make_focal_kernel(n, c, tile_n, tiles_per_split, gamma, size_average):
    g = float(gamma)
    inv_n = 1.0 / float(n)
    g_int = int(g) if (g == float(int(g)) and 0.0 <= g <= 8.0) else None

    def kernel(logits_ref, targets_ref, alpha_ref, out_ref):
        s = pl.program_id(0)
        j = pl.program_id(1)
        j_last = pl.num_programs(1) - 1

        # Per-split partial sum lives directly in the (1,1,1) output block,
        # which stays resident in VMEM across the inner (reduction) axis.
        @pl.when(j == 0)
        def _init():
            out_ref[...] = jnp.zeros_like(out_ref)

        x = logits_ref[...].astype(jnp.float32)      # (C, TILE_N)
        t = targets_ref[...]                         # (1, TILE_N) int32
        a = alpha_ref[...].astype(jnp.float32)       # (C, 1)

        # One-hot "gather" over the (small) class/sublane axis, built by
        # broadcasting a (C,1) iota column against the (1,TILE_N) targets
        # (== scatter_(1, ids, 1) of the reference, without a full-tile iota).
        cls = jax.lax.broadcasted_iota(jnp.int32, (c, 1), 0)
        hit = cls == t                               # (C, TILE_N) bool

        # Stable log-softmax pieces, reduced over the small class axis.
        m = jnp.max(x, axis=0, keepdims=True)                      # (1, TILE_N)
        sum_exp = jnp.sum(jnp.exp(x - m), axis=0, keepdims=True)   # (1, TILE_N)

        # Target logit / target alpha via select + reduce (no convert, no mul).
        # The finite -1e30 fill keeps out-of-range targets harmless: they end
        # up with a_t == 0 and a loss contribution of exactly 0 (never NaN).
        x_t = jnp.max(jnp.where(hit, x, jnp.float32(-1e30)), axis=0, keepdims=True)
        a_t = jnp.sum(jnp.where(hit, a, 0.0), axis=0, keepdims=True)

        log_p = (x_t - m) - jnp.log(sum_exp)         # log P[target] <= 0
        p = jnp.exp(log_p)
        omp = 1.0 - p                                # in [0, 1] by construction

        # (1 - p)^gamma : integer-gamma fast path (default gamma=2 -> one mul)
        if g_int is not None:
            focal = jnp.ones_like(omp)
            for _ in range(g_int):
                focal = focal * omp
        else:
            focal = jnp.exp(g * jnp.log(jnp.maximum(omp, 1e-30)))

        loss = -a_t * focal * log_p                  # (1, TILE_N)

        # Unclamped linear tile index -> first sample of this tile.  The lane
        # mask (iota + compare + where) only runs on tiles that actually hold
        # padded / duplicated samples; full tiles take the cheap path.
        base = (s * tiles_per_split + j) * tile_n
        full_tile = base + tile_n <= n

        @pl.when(full_tile)
        def _acc_full():
            out_ref[...] += jnp.sum(loss, axis=-1, keepdims=True).reshape(1, 1, 1)

        @pl.when(jnp.logical_not(full_tile))
        def _acc_masked():
            lane = jax.lax.broadcasted_iota(jnp.int32, (1, tile_n), 1)
            valid = (base + lane) < n
            masked = jnp.where(valid, loss, 0.0)     # select, so garbage lanes
            out_ref[...] += jnp.sum(masked, axis=-1, keepdims=True).reshape(1, 1, 1)

        if size_average:
            @pl.when(j == j_last)
            def _finalize():
                out_ref[...] = out_ref[...] * jnp.float32(inv_n)

    return kernel


def _default_num_splits():
    # v7x-class chips have two TensorCores per chip; everywhere else a split
    # axis is pure overhead (serial loop + duplicated tail tiles), so keep 1.
    try:
        kind = jax.devices()[0].device_kind.lower()
    except Exception:
        return 1
    return 2 if ("v7" in kind or "tpu7" in kind) else 1


def focal_loss(logits, targets, alpha=None, *, gamma=2.0, size_average=True,
               class_major=False, num_splits=None):
    """Focal loss matching methods/focal.py::FocalLoss.forward.

    logits:  (N, C) float array (any float dtype), or (C, N) if class_major=True.
    targets: (N,) integer class ids.
    alpha:   (C,), (C, 1) or None (defaults to ones, like torch.ones(C, 1)).
    """
    if class_major:
        c, n = logits.shape
        logits_cn = logits                           # already lane-dense (C, N)
    else:
        n, c = logits.shape
        # NOTE: this standalone transpose costs one extra HBM read+write pass.
        # If the producer can emit class-major logits (e.g. compute the final
        # projection as W @ x.T), pass class_major=True to skip it entirely.
        logits_cn = jnp.transpose(logits)            # (C, N)

    if alpha is None:
        alpha_col = jnp.ones((c, 1), dtype=jnp.float32)
    else:
        alpha_col = jnp.asarray(alpha, jnp.float32).reshape(c, 1)

    targets_row = jnp.asarray(targets, jnp.int32).reshape(1, n)

    # ---- Tile sizing: big batch tiles (multiple of 128 lanes), capped so the
    # double-buffered logits+targets blocks stay within a ~12 MiB budget.
    itemsize = jnp.dtype(logits_cn.dtype).itemsize
    c_pad = -(-c // 8) * 8                           # sublane padding of the class axis
    per_lane_blocks = 2 * (c_pad * itemsize + 4)     # 2 buffers x (logits + targets)
    block_budget = 12 * 1024 * 1024
    max_tile = max(128, (block_budget // per_lane_blocks) // 128 * 128)
    tile_n = max(128, min(max_tile, 64 * 1024, 128 * pl.cdiv(n, 128)))

    total_tiles = pl.cdiv(n, tile_n)

    if num_splits is None:
        num_splits = _default_num_splits()
    num_splits = max(1, min(int(num_splits), total_tiles))
    tiles_per_split = pl.cdiv(total_tiles, num_splits)

    def tile_idx(s, j):
        # Clamp so duplicated tail tiles never index out of range; their lanes
        # are fully masked to zero inside the kernel (unclamped base index).
        return jnp.minimum(s * tiles_per_split + j, total_tiles - 1)

    # ---- VMEM limit derived from the actual block sizes + f32 temporaries.
    block_bytes = tile_n * per_lane_blocks + 2 * c_pad * 4          # + alpha block
    temp_bytes = tile_n * (4 * c_pad + 24) * 4                      # generous f32 temps
    vmem_limit = int(min(56 << 20, max(16 << 20, block_bytes + temp_bytes + (4 << 20))))

    if num_splits > 1:
        # Real TensorCore sharding of the leading split axis (v7x).
        dims = (getattr(pltpu, "CORE_PARALLEL", "parallel"),
                getattr(pltpu, "ARBITRARY", "arbitrary"))
    else:
        dims = ("arbitrary", "arbitrary")

    out = pl.pallas_call(
        _make_focal_kernel(n, c, tile_n, tiles_per_split, gamma, size_average),
        out_shape=jax.ShapeDtypeStruct((num_splits, 1, 1), jnp.float32),
        grid_spec=pltpu.PrefetchScalarGridSpec(
            num_scalar_prefetch=0,
            grid=(num_splits, tiles_per_split),
            in_specs=[
                pl.BlockSpec((c, tile_n), lambda s, j: (0, tile_idx(s, j))),
                pl.BlockSpec((1, tile_n), lambda s, j: (0, tile_idx(s, j))),
                pl.BlockSpec((c, 1), lambda s, j: (0, 0)),
            ],
            out_specs=pl.BlockSpec((1, 1, 1), lambda s, j: (s, 0, 0)),
        ),
        compiler_params=pltpu.CompilerParams(
            dimension_semantics=dims,
            vmem_limit_bytes=vmem_limit,
        ),
    )(logits_cn, targets_row, alpha_col)

    # Sum the per-split partials (one add; each split is already /N if averaging).
    return jnp.sum(out)


def _reference_focal_loss(logits, targets, alpha, gamma=2.0, size_average=True):
    p = jax.nn.softmax(logits.astype(jnp.float32), axis=1)
    n = logits.shape[0]
    probs = p[jnp.arange(n), targets].reshape(-1, 1)
    a = jnp.asarray(alpha, jnp.float32).reshape(-1)[targets].reshape(-1, 1)
    batch_loss = -a * jnp.power(1.0 - probs, gamma) * jnp.log(probs)
    return jnp.mean(batch_loss) if size_average else jnp.sum(batch_loss)


if __name__ == "__main__":
    key = jax.random.PRNGKey(0)
    k1, k2, k3, k4 = jax.random.split(key, 4)

    # Small shapes consistent with the module: N observations, C classes.
    N, C = 8, 4
    logits = jax.random.normal(k1, (N, C), dtype=jnp.float32)
    targets = jax.random.randint(k2, (N,), 0, C, dtype=jnp.int32)
    alpha = jnp.ones((C, 1), dtype=jnp.float32)     # matches torch.ones(class_num, 1)

    loss = jax.block_until_ready(
        focal_loss(logits, targets, alpha, gamma=2.0, size_average=True))
    ref = _reference_focal_loss(logits, targets, alpha, 2.0, True)
    assert jnp.allclose(loss, ref, rtol=1e-5, atol=1e-6), (loss, ref)

    # Second check: non-multiple-of-128 batch (exercises the masked tail tile)
    # and sum (size_average=False) reduction.
    N2 = 333
    logits2 = jax.random.normal(k3, (N2, C), dtype=jnp.float32)
    targets2 = jax.random.randint(k4, (N2,), 0, C, dtype=jnp.int32)
    loss2 = jax.block_until_ready(
        focal_loss(logits2, targets2, alpha, gamma=2.0, size_average=False))
    ref2 = _reference_focal_loss(logits2, targets2, alpha, 2.0, False)
    assert jnp.allclose(loss2, ref2, rtol=1e-5, atol=1e-5), (loss2, ref2)

    print("KERNEL_OK")
</pallas_src>

<mosaic_0001>
module attributes {stable_mosaic.version = 11 : i64} {
  func.func @kernel(%arg0: i32, %arg1: i32, %arg2: memref<4x128xf32, #tpu.memory_space<vmem>>, %arg3: memref<1x128xi32, #tpu.memory_space<vmem>>, %arg4: memref<4x1xf32, #tpu.memory_space<vmem>>, %arg5: memref<1x1x1xf32, #tpu.memory_space<vmem>>) attributes {dimension_semantics = [#tpu.dimension_semantics<arbitrary>, #tpu.dimension_semantics<arbitrary>], iteration_bounds = array<i64: 1, 1>, scalar_prefetch = 0 : i64, scratch_operands = 0 : i64, tpu.core_type = #tpu.core_type<tc>, window_params = [{transform_indices = @transform_0, window_bounds = array<i64: 4, 128>}, {transform_indices = @transform_1, window_bounds = array<i64: 1, 128>}, {pipeline_mode = #tpu.pipeline_mode<synchronous>, transform_indices = @transform_2, window_bounds = array<i64: 4, 1>}, {transform_indices = @transform_3, window_bounds = array<i64: 1, 1, 1>}]} {
    %c0_i32 = arith.constant 0 : i32
    %0 = arith.cmpi eq, %arg1, %c0_i32 : i32
    %1 = arith.extui %0 : i1 to i32
    %c0_i32_0 = arith.constant 0 : i32
    %2 = arith.cmpi ne, %1, %c0_i32_0 : i32
    scf.if %2 {
      %cst_19 = arith.constant 0.000000e+00 : f32
      %53 = vector.broadcast %cst_19 : f32 to vector<1x1x1xf32>
      %c0_20 = arith.constant 0 : index
      %c0_21 = arith.constant 0 : index
      %c0_22 = arith.constant 0 : index
      %54 = vector.load %arg5[%c0_20, %c0_21, %c0_22] : memref<1x1x1xf32, #tpu.memory_space<vmem>>, vector<1x1x1xf32>
      tpu.vector_store %arg5[%c0_20, %c0_21, %c0_22], %53 {strides = array<i32>} : memref<1x1x1xf32, #tpu.memory_space<vmem>>, vector<1x1x1xf32>,
    } else {
    }
    %c0 = arith.constant 0 : index
    %c0_1 = arith.constant 0 : index
    %3 = vector.load %arg2[%c0, %c0_1] : memref<4x128xf32, #tpu.memory_space<vmem>>, vector<4x128xf32>
    %c0_2 = arith.constant 0 : index
    %c0_3 = arith.constant 0 : index
    %4 = vector.load %arg3[%c0_2, %c0_3] : memref<1x128xi32, #tpu.memory_space<vmem>>, vector<1x128xi32>
    %c0_4 = arith.constant 0 : index
    %c0_5 = arith.constant 0 : index
    %5 = vector.load %arg4[%c0_4, %c0_5] : memref<4x1xf32, #tpu.memory_space<vmem>>, vector<4x1xf32>
    %6 = tpu.iota {dimensions = array<i32: 0>} : vector<4x1xi32>
    %7 = vector.broadcast %6 : vector<4x1xi32> to vector<4x128xi32>
    %8 = vector.broadcast %4 : vector<1x128xi32> to vector<4x128xi32>
    %9 = arith.cmpi eq, %7, %8 : vector<4x128xi32>
    %cst = arith.constant dense<0xFF800000> : vector<128xf32>
    %10 = vector.multi_reduction <maximumf>, %3, %cst [0] : vector<4x128xf32> to vector<128xf32>
    %11 = vector.shape_cast %10 : vector<128xf32> to vector<1x128xf32>
    %12 = vector.broadcast %11 : vector<1x128xf32> to vector<4x128xf32>
    %13 = arith.subf %3, %12 : vector<4x128xf32>
    %14 = math.exp %13 : vector<4x128xf32>
    %cst_6 = arith.constant dense<0.000000e+00> : vector<128xf32>
    %15 = vector.multi_reduction <add>, %14, %cst_6 [0] : vector<4x128xf32> to vector<128xf32>
    %16 = vector.shape_cast %15 : vector<128xf32> to vector<1x128xf32>
    %cst_7 = arith.constant -1.000000e+30 : f32
    %17 = vector.broadcast %cst_7 : f32 to vector<4x128xf32>
    %18 = arith.select %9, %3, %17 : vector<4x128xi1>, vector<4x128xf32>
    %cst_8 = arith.constant dense<0xFF800000> : vector<128xf32>
    %19 = vector.multi_reduction <maximumf>, %18, %cst_8 [0] : vector<4x128xf32> to vector<128xf32>
    %20 = vector.shape_cast %19 : vector<128xf32> to vector<1x128xf32>
    %cst_9 = arith.constant 0.000000e+00 : f32
    %21 = vector.shape_cast %5 : vector<4x1xf32> to vector<4x1xf32>
    %22 = vector.broadcast %21 : vector<4x1xf32> to vector<4x128xf32>
    %23 = vector.broadcast %cst_9 : f32 to vector<4x128xf32>
    %24 = arith.select %9, %22, %23 : vector<4x128xi1>, vector<4x128xf32>
    %cst_10 = arith.constant dense<0.000000e+00> : vector<128xf32>
    %25 = vector.multi_reduction <add>, %24, %cst_10 [0] : vector<4x128xf32> to vector<128xf32>
    %26 = vector.shape_cast %25 : vector<128xf32> to vector<1x128xf32>
    %27 = arith.subf %20, %11 : vector<1x128xf32>
    %28 = math.log %16 : vector<1x128xf32>
    %29 = arith.subf %27, %28 : vector<1x128xf32>
    %30 = math.exp %29 : vector<1x128xf32>
    %cst_11 = arith.constant 1.000000e+00 : f32
    %31 = vector.broadcast %cst_11 : f32 to vector<1x128xf32>
    %32 = arith.subf %31, %30 : vector<1x128xf32>
    %cst_12 = arith.constant 1.000000e+00 : f32
    %33 = vector.broadcast %cst_12 : f32 to vector<1x128xf32>
    %34 = arith.mulf %33, %32 : vector<1x128xf32>
    %35 = arith.mulf %34, %32 : vector<1x128xf32>
    %cst_13 = arith.constant 0.000000e+00 : f32
    %36 = vector.broadcast %cst_13 : f32 to vector<1x128xf32>
    %37 = arith.subf %36, %26 : vector<1x128xf32>
    %38 = arith.mulf %37, %35 : vector<1x128xf32>
    %39 = arith.mulf %38, %29 : vector<1x128xf32>
    %c1_i32 = arith.constant 1 : i32
    %40 = arith.muli %arg0, %c1_i32 : i32
    %41 = arith.addi %40, %arg1 : i32
    %c128_i32 = arith.constant 128 : i32
    %42 = arith.muli %41, %c128_i32 : i32
    %c128_i32_14 = arith.constant 128 : i32
    %43 = arith.addi %42, %c128_i32_14 : i32
    %c8_i32 = arith.constant 8 : i32
    %44 = arith.cmpi sle, %43, %c8_i32 : i32
    %45 = arith.extui %44 : i1 to i32
    %c0_i32_15 = arith.constant 0 : i32
    %46 = arith.cmpi ne, %45, %c0_i32_15 : i32
    scf.if %46 {
      %c0_19 = arith.constant 0 : index
      %c0_20 = arith.constant 0 : index
      %c0_21 = arith.constant 0 : index
      %53 = vector.load %arg5[%c0_19, %c0_20, %c0_21] : memref<1x1x1xf32, #tpu.memory_space<vmem>>, vector<1x1x1xf32>
      %cst_22 = arith.constant dense<0.000000e+00> : vector<1xf32>
      %54 = vector.multi_reduction <add>, %39, %cst_22 [1] : vector<1x128xf32> to vector<1xf32>
      %55 = vector.shape_cast %54 : vector<1xf32> to vector<1x1xf32>
      %56 = vector.shape_cast %55 : vector<1x1xf32> to vector<1x1x1xf32>
      %57 = arith.addf %53, %56 : vector<1x1x1xf32>
      %c0_23 = arith.constant 0 : index
      %c0_24 = arith.constant 0 : index
      %c0_25 = arith.constant 0 : index
      %58 = vector.load %arg5[%c0_23, %c0_24, %c0_25] : memref<1x1x1xf32, #tpu.memory_space<vmem>>, vector<1x1x1xf32>
      tpu.vector_store %arg5[%c0_23, %c0_24, %c0_25], %57 {strides = array<i32>} : memref<1x1x1xf32, #tpu.memory_space<vmem>>, vector<1x1x1xf32>,
    } else {
    }
    %true = arith.constant true
    %47 = arith.xori %44, %true : i1
    %48 = arith.extui %47 : i1 to i32
    %c0_i32_16 = arith.constant 0 : i32
    %49 = arith.cmpi ne, %48, %c0_i32_16 : i32
    scf.if %49 {
      %53 = tpu.iota {dimensions = array<i32: 1>} : vector<1x128xi32>
      %54 = vector.broadcast %42 : i32 to vector<1x128xi32>
      %55 = arith.addi %54, %53 : vector<1x128xi32>
      %c8_i32_19 = arith.constant 8 : i32
      %56 = vector.broadcast %c8_i32_19 : i32 to vector<1x128xi32>
      %57 = arith.cmpi slt, %55, %56 : vector<1x128xi32>
      %cst_20 = arith.constant 0.000000e+00 : f32
      %58 = vector.broadcast %cst_20 : f32 to vector<1x128xf32>
      %59 = arith.select %57, %39, %58 : vector<1x128xi1>, vector<1x128xf32>
      %c0_21 = arith.constant 0 : index
      %c0_22 = arith.constant 0 : index
      %c0_23 = arith.constant 0 : index
      %60 = vector.load %arg5[%c0_21, %c0_22, %c0_23] : memref<1x1x1xf32, #tpu.memory_space<vmem>>, vector<1x1x1xf32>
      %cst_24 = arith.constant dense<0.000000e+00> : vector<1xf32>
      %61 = vector.multi_reduction <add>, %59, %cst_24 [1] : vector<1x128xf32> to vector<1xf32>
      %62 = vector.shape_cast %61 : vector<1xf32> to vector<1x1xf32>
      %63 = vector.shape_cast %62 : vector<1x1xf32> to vector<1x1x1xf32>
      %64 = arith.addf %60, %63 : vector<1x1x1xf32>
      %c0_25 = arith.constant 0 : index
      %c0_26 = arith.constant 0 : index
      %c0_27 = arith.constant 0 : index
      %65 = vector.load %arg5[%c0_25, %c0_26, %c0_27] : memref<1x1x1xf32, #tpu.memory_space<vmem>>, vector<1x1x1xf32>
      tpu.vector_store %arg5[%c0_25, %c0_26, %c0_27], %64 {strides = array<i32>} : memref<1x1x1xf32, #tpu.memory_space<vmem>>, vector<1x1x1xf32>,
    } else {
    }
    %c0_i32_17 = arith.constant 0 : i32
    %50 = arith.cmpi eq, %arg1, %c0_i32_17 : i32
    %51 = arith.extui %50 : i1 to i32
    %c0_i32_18 = arith.constant 0 : i32
    %52 = arith.cmpi ne, %51, %c0_i32_18 : i32
    scf.if %52 {
      %c0_19 = arith.constant 0 : index
      %c0_20 = arith.constant 0 : index
      %c0_21 = arith.constant 0 : index
      %53 = vector.load %arg5[%c0_19, %c0_20, %c0_21] : memref<1x1x1xf32, #tpu.memory_space<vmem>>, vector<1x1x1xf32>
      %cst_22 = arith.constant 1.250000e-01 : f32
      %54 = vector.broadcast %cst_22 : f32 to vector<1x1x1xf32>
      %55 = arith.mulf %53, %54 : vector<1x1x1xf32>
      %c0_23 = arith.constant 0 : index
      %c0_24 = arith.constant 0 : index
      %c0_25 = arith.constant 0 : index
      %56 = vector.load %arg5[%c0_23, %c0_24, %c0_25] : memref<1x1x1xf32, #tpu.memory_space<vmem>>, vector<1x1x1xf32>
      tpu.vector_store %arg5[%c0_23, %c0_24, %c0_25], %55 {strides = array<i32>} : memref<1x1x1xf32, #tpu.memory_space<vmem>>, vector<1x1x1xf32>,
    } else {
    }
    return
  }
  func.func @transform_0(%arg0: i32, %arg1: i32) -> (i32, i32) {
    %c1_i32 = arith.constant 1 : i32
    %0 = arith.muli %arg0, %c1_i32 : i32
    %1 = arith.addi %0, %arg1 : i32
    %c0_i32 = arith.constant 0 : i32
    %2 = arith.minsi %1, %c0_i32 : i32
    %c0_i32_0 = arith.constant 0 : i32
    %c0_i32_1 = arith.constant 0 : i32
    return %c0_i32_0, %2 : i32, i32
  }
  func.func @transform_1(%arg0: i32, %arg1: i32) -> (i32, i32) {
    %c1_i32 = arith.constant 1 : i32
    %0 = arith.muli %arg0, %c1_i32 : i32
    %1 = arith.addi %0, %arg1 : i32
    %c0_i32 = arith.constant 0 : i32
    %2 = arith.minsi %1, %c0_i32 : i32
    %c0_i32_0 = arith.constant 0 : i32
    %c0_i32_1 = arith.constant 0 : i32
    return %c0_i32_0, %2 : i32, i32
  }
  func.func @transform_2(%arg0: i32, %arg1: i32) -> (i32, i32) {
    %c0_i32 = arith.constant 0 : i32
    %c0_i32_0 = arith.constant 0 : i32
    %c0_i32_1 = arith.constant 0 : i32
    return %c0_i32, %c0_i32_0 : i32, i32
  }
  func.func @transform_3(%arg0: i32, %arg1: i32) -> (i32, i32, i32) {
    %c0_i32 = arith.constant 0 : i32
    %c0_i32_0 = arith.constant 0 : i32
    %c0_i32_1 = arith.constant 0 : i32
    return %arg0, %c0_i32, %c0_i32_0 : i32, i32, i32
  }
}

</mosaic_0001>

<bundles_post_ra>
// kernel: tpu_custom_call.1
= control target key start
LH: loop header
LB: loop body
LE: loop exit
PB: predicated region body
PF: predicated region fallthrough
CT: control target
= control target key end

     0   :  { %v226_v1 = vmov 0   ;;  %s276_s0 = inlined_call_operand.vmem [shape: f32[4,8], index: 0, kind: input, shape index: {}]   ;;  %s277_s1 = inlined_call_operand.vmem [shape: s32[1,8], index: 1, kind: input, shape index: {}]   ;;  %s278_s2 = inlined_call_operand.vmem [shape: f32[4,1], index: 2, kind: input, shape index: {}]   ;;  %s279_s3 = inlined_call_operand.hbm [shape: f32[1,1,1], index: 3, kind: output, shape index: {}]  }
   0x1   :  { %v74_v0 = vld [vmem:[%s278_s2] sm:$0xf]  ;;  %195 = vset.pattern.permute.xlu0 %v226_v1 }
   0x2   :  { %8 = vsyncpa [#allocation3], 0  ;;  %110 = vperm.xlu0 %195, %v74_v0   ;;  %vm82_vm0 = vcmask 1043456   ;;  %v72_v2 = vld [vmem:[%s276_s0] sm:$0xf]  ;;  %v75_v13 = vlaneseq  ;;  %vm70_vm3 = vcmask 0  }
   0x3   :  { %v83_v3 = vsel %vm82_vm0, %v72_v2, -inf  ;;  %v191_v17 = vld [vmem:[%s277_s1] ss:$0 sm:$0xff]  ;;  %v227_v53 = vmov 0.0   ;;  %s228_s0 = smov [#allocation2]  }
   0x4   :  { %v84_v4 = vrot.slane %v83_v3, 4  ;;  %v76_v15 = vshrl.u32 %v75_v13, 7  ;;  %v150_v48 = vand.u32 127, %v75_v13  ;;  %71 = vst.msk [vmem:[#allocation2] sm:$0x1] %vm70_vm3, %v227_v53  ;;  %s174_s1 = sshll.u32 %s228_s0, 4  ;;  %s175_s1 = int_to_ptr.vmem [resolvable:$true] %s174_s1 }
   0x5   :  { %s202_s17 = scalar_lea.vmem %s175_s1, 16  ;;  %s206_s18 = scalar_lea.vmem %s175_s1, 32 }
   0x6   :  { %v85_v5 = vmax.f32 %v83_v3, %v84_v4  ;;  %vm81_vm1 = vcmp.eq.s32.totalorder %v76_v15, %v191_v17  ;;  %vm153_vm2 = vcmp.lt.s32.totalorder %v150_v48, 8  ;;  %p203_p0 = scmp.ne.s32.totalorder %s175_s1, %s202_s17  ;;  %p207_p1 = scmp.lt.s32.totalorder %s175_s1, %s175_s1 }
   0x7   :  { %v100_v19 = vsel %vm81_vm1, %v72_v2, -1e+30  ;;  %p208_p2 = scmp.lt.s32.totalorder %s206_s18, %s202_s17 }
   0x8   :  { %v86_v6 = vrot.slane %v85_v5, 2  ;;  %v101_v21 = vsel %vm82_vm0, %v100_v19, -inf }
   0x9   :  { %v102_v23 = vrot.slane %v101_v21, 4  ;;  %p209_p3 = por %p208_p2, %p207_p1 }
   0xa   :  { %v87_v7 = vmax.f32 %v85_v5, %v86_v6 }
   0xb   :  { %v103_v25 = vmax.f32 %v101_v21, %v102_v23  ;;  %v155_v54 = vld [vmem:[#allocation2] sm:$0x1]  ;;  %p210_p4 = pnand %p209_p3, %p203_p0 }
   0xc   :  { %v88_v8 = vrot.slane %v87_v7, 1 }
   0xd   :  { %v104_v27 = vrot.slane %v103_v25, 2 }
   0xe   :  { %v89_v9 = vmax.f32 %v87_v7, %v88_v8 }
   0xf   :  { %v105_v28 = vmax.f32 %v103_v25, %v104_v27 }
  0x10   :  { %v90_v10 = vsub.f32 %v72_v2, %v89_v9 }
  0x11   :  { %v106_v29 = vrot.slane %v105_v28, 1 }
  0x12   :  { %v91_v11 = vmul.f32 1.442695, %v90_v10 }
  0x13   :  { %v107_v30 = vmax.f32 %v105_v28, %v106_v29 }
  0x14   :  { %196 = vpow2.f32 %v91_v11 }
  0x15   :  { %v121_v32 = vsub.f32 %v107_v30, %v89_v9 }
  0x1e   :  { %v197_v12 = vpop.eup %196 }
  0x1f   :  { %v93_v14 = vsel %vm82_vm0, %v197_v12, 0.0 }
  0x20   :  { %v94_v16 = vrot.slane %v93_v14, 4 }
  0x22   :  { %v95_v18 = vadd.f32 %v94_v16, %v93_v14 }
  0x24   :  { %v96_v20 = vrot.slane %v95_v18, 2 }
  0x26   :  { %v97_v22 = vadd.f32 %v96_v20, %v95_v18 }
  0x28   :  { %v98_v24 = vrot.slane %v97_v22, 1 }
  0x2a   :  { %v99_v26 = vadd.f32 %v98_v24, %v97_v22 }
  0x2c   :  { %198 = vlog2.f32 %v99_v26 }
  0x36   :  { %v199_v31 = vpop.eup %198 }
  0x37   :  { %v123_v33 = vmul.f32 0.6931472, %v199_v31 }
  0x39   :  { %v124_v34 = vsub.f32 %v121_v32, %v123_v33 }
  0x3b   :  { %v125_v35 = vmul.f32 1.442695, %v124_v34 }
  0x3d   :  { %200 = vpow2.f32 %v125_v35 }
  0x47   :  { %v201_v41 = vpop.eup %200 }
  0x48   :  { %v127_v44 = vsub.f32 1.0, %v201_v41 }
  0x4a   :  { %v128_v47 = vmul.f32 %v127_v44, %v127_v44 }
  0x81   :  { %v111_v36 = vpop.permute.xlu0 %110 }
  0x82   :  { %v113_v37 = vsel %vm81_vm1, %v111_v36, 0.0 }
  0x83   :  { %v114_v38 = vsel %vm82_vm0, %v113_v37, 0.0 }
  0x84   :  { %v115_v39 = vrot.slane %v114_v38, 4 }
  0x86   :  { %v116_v40 = vadd.f32 %v115_v39, %v114_v38 }
  0x88   :  { %v117_v42 = vrot.slane %v116_v40, 2 }
  0x8a   :  { %v118_v43 = vadd.f32 %v117_v42, %v116_v40 }
  0x8c   :  { %v119_v45 = vrot.slane %v118_v43, 1 }
  0x8e   :  { %v120_v46 = vadd.f32 %v119_v45, %v118_v43 }
  0x90   :  { %v129_v49 = vsub.f32 0.0, %v120_v46 }
  0x92   :  { %v130_v50 = vmul.f32 %v129_v49, %v128_v47 }
  0x94   :  { %v131_v51 = vmul.f32 %v130_v50, %v124_v34 }
  0x96   :  { %v154_v52 = vsel %vm153_vm2, %v131_v51, 0.0 }
  0x97   :  { %156 = vadd.xlane.f32.xlu0 %v154_v52 }
 0x124   :  { %v157_v55 = vpop.xlane.xlu0 %156 }
 0x125   :  { %v158_v56 = vadd.f32 %v157_v55, %v155_v54 }
 0x127   :  { %160 = vst.msk [vmem:[#allocation2] sm:$0x1] %vm70_vm3, %v158_v56 }
 0x12e   :  { %v164_v57 = vld [vmem:[#allocation2] sm:$0x1] }
 0x12f   :  { %v165_v58 = vmul.f32 0.125, %v164_v57 }
 0x131   :  { %167 = vst.msk [vmem:[#allocation2] sm:$0x1] %vm70_vm3, %v165_v58 }
 0x132   :  { %213 = shalt.err (!%p210_p4)
}
 0x133   :  { %s214_s21 = scalar_lea.hbm %s279_s3, 16 }
 0x134   :  { %p215_p5 = scmp.ne.s32.totalorder %s279_s3, %s214_s21  ;;  %p218_p6 = scmp.lt.u32.totalorder %s214_s21, %s279_s3 }
 0x136   :  { %p220_p7 = pnand %p218_p6, %p215_p5 }
 0x138   :  { %223 = shalt.err (!%p220_p7)
}
 0x139   :  { %177 = dma.vmem_to_hbm [thread:$0]  %s175_s1, 16, %s279_s3, [#allocation3]  }
 0x13a   :  { %224 = dma.done.wait [#allocation3], 16  }
 0x13b   :  { %225 = vsyncadd [#allocation3], 4294967280 }
 0x13c   :  { %181 = vsyncpa [#allocation3], 1 }

</bundles_post_ra>
